<compile_context>
chip_gen: v7x
topology: tpu7x:2x2x1
jax: 0.10.0
libtpu: 0.0.40
codegen_flags: <defaults>
</compile_context>

<pallas_src>
import functools

import jax
import jax.numpy as jnp
from jax.experimental import pallas as pl
from jax.experimental.pallas import tpu as pltpu

_LANE = 128
_SUBLANE = 8
_TL_CAP = 8192           # max length-tile (lanes); 128-multiple
_TL_DIVISOR_FLOOR = 2048 # don't shrink TL below this just to avoid the mask


def _device_budgets():
    """Per-generation (input tile byte budget, vmem_limit_bytes)."""
    try:
        info = pltpu.get_tpu_info()
        vmem = int(getattr(info, "vmem_capacity_bytes", 128 * 1024 * 1024))
    except Exception:
        vmem = 128 * 1024 * 1024
    if vmem <= 64 * 1024 * 1024:
        # v7x-class: 64 MiB VMEM / ~3.2 TB/s HBM -> bigger tiles to amortize the
        # ~0.35 us per-grid-step overhead, but leave headroom in 64 MiB.
        return 8 * 1024 * 1024, 40 * 1024 * 1024
    # v5e / v6e: 128 MiB physical VMEM. Explicit limit is load-bearing on v5e
    # (default scoped limit is only 16 MiB, below 2x the tile size).
    return 6 * 1024 * 1024, 48 * 1024 * 1024


def _choose_tiles(R, L, itemsize, tile_budget):
    """Pick (TR, TL) row/length tiles that are legal block dims on all TPU gens."""
    # ---- TL (lane) tile ----
    if L <= _TL_CAP:
        TL = L                                   # equal to full dim -> always legal
    else:
        # Prefer a 128-multiple divisor of L (no ragged tail, no mask path).
        TL = 0
        t = (_TL_CAP // _LANE) * _LANE
        while t >= _TL_DIVISOR_FLOOR:
            if L % t == 0:
                TL = t
                break
            t -= _LANE
        if TL == 0:
            # Split L near-evenly into 128-multiple chunks (avoids a nearly
            # empty last step); ragged tail is masked only on the last L step.
            nsteps = pl.cdiv(L, _TL_CAP)
            TL = pl.cdiv(pl.cdiv(L, nsteps), _LANE) * _LANE

    # ---- TR (row) tile ----
    # TR must be a multiple of 128 (lane-dense (1, TR) output block) unless it
    # covers R exactly.
    rows_budget = max(_SUBLANE, tile_budget // (TL * itemsize))
    if R <= rows_budget:
        TR = R
        if R >= 2 * _LANE:
            # Guarantee >=2 row blocks so the "parallel" axis can shard across
            # v7x's two TensorCores.
            TR = max(_LANE, ((R // 2) // _LANE) * _LANE)
    else:
        TR = max(_LANE, (rows_budget // _LANE) * _LANE)
        TR = min(TR, R)                          # only hit when R < 128 (full dim)
    return TR, TL


def _concat_pool_kernel(x_ref, mx_ref, av_ref, max_acc, sum_acc, *, L, TL):
    li = pl.program_id(1)
    last = pl.num_programs(1) - 1

    @pl.when(li == 0)
    def _init():
        max_acc[...] = jnp.full_like(max_acc, -jnp.inf)
        sum_acc[...] = jnp.zeros_like(sum_acc)

    def _accumulate(x_max, x_sum):
        # Max in native dtype (bf16-native VPU on v6e/v7x); sum accumulated in f32.
        blk_max = jnp.max(x_max, axis=-1, keepdims=True).astype(jnp.float32)  # (TR,1)
        blk_sum = jnp.sum(x_sum, axis=-1, keepdims=True, dtype=jnp.float32)   # (TR,1)
        max_acc[...] = jnp.maximum(max_acc[...], blk_max)
        sum_acc[...] = sum_acc[...] + blk_sum

    if L % TL != 0:
        # Ragged L: pay for the mask only on the final (partial) L step.
        @pl.when(li != last)
        def _clean():
            x = x_ref[...]
            _accumulate(x, x)

        @pl.when(li == last)
        def _masked():
            x = x_ref[...]
            col = jax.lax.broadcasted_iota(jnp.int32, x.shape, 1) + li * TL
            valid = col < L
            _accumulate(
                jnp.where(valid, x, jnp.asarray(-jnp.inf, x.dtype)),
                jnp.where(valid, x, jnp.asarray(0, x.dtype)),
            )
    else:
        x = x_ref[...]
        _accumulate(x, x)

    @pl.when(li == last)
    def _finalize():
        # (TR, 1) accumulators -> lane-dense (1, TR) output rows.
        mx_ref[...] = max_acc[...].T.astype(mx_ref.dtype)
        av_ref[...] = (sum_acc[...].T / jnp.float32(L)).astype(av_ref.dtype)


def adaptive_concat_pool1d(x):
    """x: (N, C, L) -> (N, 2*C, 1), matching torch.cat([maxpool1(x), avgpool1(x)], 1)."""
    assert jnp.issubdtype(x.dtype, jnp.floating), "floating-point input required"
    N, C, L = x.shape
    R = N * C
    xf = x.reshape(R, L)                           # free contiguous reshape
    itemsize = jnp.dtype(x.dtype).itemsize

    tile_budget, vmem_limit = _device_budgets()
    TR, TL = _choose_tiles(R, L, itemsize, tile_budget)
    grid = (pl.cdiv(R, TR), pl.cdiv(L, TL))        # reduction (L) axis last

    kernel = functools.partial(_concat_pool_kernel, L=L, TL=TL)

    cost = pl.CostEstimate(
        flops=2 * R * L,
        transcendentals=0,
        bytes_accessed=R * L * itemsize + 2 * R * itemsize,
    )

    mx, av = pl.pallas_call(
        kernel,
        out_shape=(
            jax.ShapeDtypeStruct((1, R), x.dtype),   # max, lane-dense
            jax.ShapeDtypeStruct((1, R), x.dtype),   # avg, lane-dense
        ),
        grid_spec=pltpu.PrefetchScalarGridSpec(
            num_scalar_prefetch=0,
            grid=grid,
            in_specs=[pl.BlockSpec((TR, TL), lambda r, l: (r, l))],
            out_specs=(
                pl.BlockSpec((1, TR), lambda r, l: (0, r)),
                pl.BlockSpec((1, TR), lambda r, l: (0, r)),
            ),
            scratch_shapes=[
                pltpu.VMEM((TR, 1), jnp.float32),    # running max
                pltpu.VMEM((TR, 1), jnp.float32),    # running sum (f32)
            ],
        ),
        compiler_params=pltpu.CompilerParams(
            dimension_semantics=("parallel", "arbitrary"),
            vmem_limit_bytes=vmem_limit,
        ),
        cost_estimate=cost,
    )(xf)

    mx = mx.reshape(N, C, 1)
    av = av.reshape(N, C, 1)
    return jnp.concatenate([mx, av], axis=1)       # max first, then avg (PyTorch order)


def _reference(x):
    return jnp.concatenate(
        [jnp.max(x, axis=-1, keepdims=True), jnp.mean(x, axis=-1, keepdims=True)],
        axis=1,
    )


if __name__ == "__main__":
    key = jax.random.PRNGKey(0)

    # Small shape consistent with the module: (batch, channels, length).
    N, C, L = 2, 4, 16
    x = jax.random.normal(key, (N, C, L), dtype=jnp.float32)
    out = jax.block_until_ready(adaptive_concat_pool1d(x))
    ref = _reference(x)
    assert out.shape == (N, 2 * C, 1), out.shape
    assert jnp.allclose(out, ref, atol=1e-5, rtol=1e-5), "mismatch vs reference (small)"

    # Moderate shape exercising the L-tiled accumulator + masked-last-step path
    # and the megacore row split (R=256 -> two row blocks).
    key2 = jax.random.PRNGKey(0)
    N2, C2, L2 = 2, 128, 9000
    x2 = jax.random.normal(key2, (N2, C2, L2), dtype=jnp.float32)
    out2 = jax.block_until_ready(adaptive_concat_pool1d(x2))
    ref2 = _reference(x2)
    assert out2.shape == (N2, 2 * C2, 1), out2.shape
    assert jnp.allclose(out2, ref2, atol=1e-4, rtol=1e-4), "mismatch vs reference (tiled)"

    print("KERNEL_OK")
</pallas_src>

<mosaic_0001>
module attributes {stable_mosaic.version = 11 : i64} {
  func.func @_concat_pool_kernel(%arg0: i32, %arg1: i32, %arg2: memref<8x16xf32, #tpu.memory_space<vmem>>, %arg3: memref<1x8xf32, #tpu.memory_space<vmem>>, %arg4: memref<1x8xf32, #tpu.memory_space<vmem>>, %arg5: memref<8x1xf32, #tpu.memory_space<vmem>>, %arg6: memref<8x1xf32, #tpu.memory_space<vmem>>) attributes {dimension_semantics = [#tpu.dimension_semantics<parallel>, #tpu.dimension_semantics<arbitrary>], iteration_bounds = array<i64: 1, 1>, scalar_prefetch = 0 : i64, scratch_operands = 2 : i64, tpu.core_type = #tpu.core_type<tc>, window_params = [{transform_indices = @transform_0, window_bounds = array<i64: 8, 16>}, {transform_indices = @transform_1, window_bounds = array<i64: 1, 8>}, {transform_indices = @transform_2, window_bounds = array<i64: 1, 8>}]} {
    %c0_i32 = arith.constant 0 : i32
    %0 = arith.cmpi eq, %arg1, %c0_i32 : i32
    %1 = arith.extui %0 : i1 to i32
    %c0_i32_0 = arith.constant 0 : i32
    %2 = arith.cmpi ne, %1, %c0_i32_0 : i32
    scf.if %2 {
      %cst_13 = arith.constant 0xFF800000 : f32
      %17 = vector.broadcast %cst_13 : f32 to vector<8x1xf32>
      %c0_14 = arith.constant 0 : index
      %c0_15 = arith.constant 0 : index
      %18 = vector.load %arg5[%c0_14, %c0_15] : memref<8x1xf32, #tpu.memory_space<vmem>>, vector<8x1xf32>
      tpu.vector_store %arg5[%c0_14, %c0_15], %17 {strides = array<i32>} : memref<8x1xf32, #tpu.memory_space<vmem>>, vector<8x1xf32>,
      %cst_16 = arith.constant 0.000000e+00 : f32
      %19 = vector.broadcast %cst_16 : f32 to vector<8x1xf32>
      %c0_17 = arith.constant 0 : index
      %c0_18 = arith.constant 0 : index
      %20 = vector.load %arg6[%c0_17, %c0_18] : memref<8x1xf32, #tpu.memory_space<vmem>>, vector<8x1xf32>
      tpu.vector_store %arg6[%c0_17, %c0_18], %19 {strides = array<i32>} : memref<8x1xf32, #tpu.memory_space<vmem>>, vector<8x1xf32>,
    } else {
    }
    %c0 = arith.constant 0 : index
    %c0_1 = arith.constant 0 : index
    %3 = vector.load %arg2[%c0, %c0_1] : memref<8x16xf32, #tpu.memory_space<vmem>>, vector<8x16xf32>
    %cst = arith.constant dense<0xFF800000> : vector<8xf32>
    %4 = vector.multi_reduction <maximumf>, %3, %cst [1] : vector<8x16xf32> to vector<8xf32>
    %5 = vector.shape_cast %4 : vector<8xf32> to vector<8x1xf32>
    %cst_2 = arith.constant dense<0.000000e+00> : vector<8xf32>
    %6 = vector.multi_reduction <add>, %3, %cst_2 [1] : vector<8x16xf32> to vector<8xf32>
    %7 = vector.shape_cast %6 : vector<8xf32> to vector<8x1xf32>
    %c0_3 = arith.constant 0 : index
    %c0_4 = arith.constant 0 : index
    %8 = vector.load %arg5[%c0_3, %c0_4] : memref<8x1xf32, #tpu.memory_space<vmem>>, vector<8x1xf32>
    %9 = arith.maximumf %8, %5 : vector<8x1xf32>
    %c0_5 = arith.constant 0 : index
    %c0_6 = arith.constant 0 : index
    %10 = vector.load %arg5[%c0_5, %c0_6] : memref<8x1xf32, #tpu.memory_space<vmem>>, vector<8x1xf32>
    tpu.vector_store %arg5[%c0_5, %c0_6], %9 {strides = array<i32>} : memref<8x1xf32, #tpu.memory_space<vmem>>, vector<8x1xf32>,
    %c0_7 = arith.constant 0 : index
    %c0_8 = arith.constant 0 : index
    %11 = vector.load %arg6[%c0_7, %c0_8] : memref<8x1xf32, #tpu.memory_space<vmem>>, vector<8x1xf32>
    %12 = arith.addf %11, %7 : vector<8x1xf32>
    %c0_9 = arith.constant 0 : index
    %c0_10 = arith.constant 0 : index
    %13 = vector.load %arg6[%c0_9, %c0_10] : memref<8x1xf32, #tpu.memory_space<vmem>>, vector<8x1xf32>
    tpu.vector_store %arg6[%c0_9, %c0_10], %12 {strides = array<i32>} : memref<8x1xf32, #tpu.memory_space<vmem>>, vector<8x1xf32>,
    %c0_i32_11 = arith.constant 0 : i32
    %14 = arith.cmpi eq, %arg1, %c0_i32_11 : i32
    %15 = arith.extui %14 : i1 to i32
    %c0_i32_12 = arith.constant 0 : i32
    %16 = arith.cmpi ne, %15, %c0_i32_12 : i32
    scf.if %16 {
      %c0_13 = arith.constant 0 : index
      %c0_14 = arith.constant 0 : index
      %17 = vector.load %arg5[%c0_13, %c0_14] : memref<8x1xf32, #tpu.memory_space<vmem>>, vector<8x1xf32>
      %18 = tpu.transpose %17, [1, 0] : vector<8x1xf32> -> vector<1x8xf32>
      %c0_15 = arith.constant 0 : index
      %c0_16 = arith.constant 0 : index
      %19 = vector.load %arg3[%c0_15, %c0_16] : memref<1x8xf32, #tpu.memory_space<vmem>>, vector<1x8xf32>
      tpu.vector_store %arg3[%c0_15, %c0_16], %18 {strides = array<i32>} : memref<1x8xf32, #tpu.memory_space<vmem>>, vector<1x8xf32>,
      %c0_17 = arith.constant 0 : index
      %c0_18 = arith.constant 0 : index
      %20 = vector.load %arg6[%c0_17, %c0_18] : memref<8x1xf32, #tpu.memory_space<vmem>>, vector<8x1xf32>
      %21 = tpu.transpose %20, [1, 0] : vector<8x1xf32> -> vector<1x8xf32>
      %cst_19 = arith.constant 1.600000e+01 : f32
      %22 = vector.broadcast %cst_19 : f32 to vector<1x8xf32>
      %23 = arith.divf %21, %22 : vector<1x8xf32>
      %c0_20 = arith.constant 0 : index
      %c0_21 = arith.constant 0 : index
      %24 = vector.load %arg4[%c0_20, %c0_21] : memref<1x8xf32, #tpu.memory_space<vmem>>, vector<1x8xf32>
      tpu.vector_store %arg4[%c0_20, %c0_21], %23 {strides = array<i32>} : memref<1x8xf32, #tpu.memory_space<vmem>>, vector<1x8xf32>,
    } else {
    }
    return
  }
  func.func @transform_0(%arg0: i32, %arg1: i32) -> (i32, i32) {
    %c0_i32 = arith.constant 0 : i32
    return %arg0, %arg1 : i32, i32
  }
  func.func @transform_1(%arg0: i32, %arg1: i32) -> (i32, i32) {
    %c0_i32 = arith.constant 0 : i32
    %c0_i32_0 = arith.constant 0 : i32
    return %c0_i32, %arg0 : i32, i32
  }
  func.func @transform_2(%arg0: i32, %arg1: i32) -> (i32, i32) {
    %c0_i32 = arith.constant 0 : i32
    %c0_i32_0 = arith.constant 0 : i32
    return %c0_i32, %arg0 : i32, i32
  }
}

</mosaic_0001>

<bundles_post_ra>
// kernel: tpu_custom_call.1
= control target key start
LH: loop header
LB: loop body
LE: loop exit
PB: predicated region body
PF: predicated region fallthrough
CT: control target
= control target key end

     0   :  { %8 = vsyncpa [#allocation5], 0  ;;  %s296_s0 = inlined_call_operand.hbm [shape: f32[8,16], index: 0, kind: input, shape index: {}]   ;;  %s297_s1 = inlined_call_operand.hbm [shape: f32[1,8], index: 1, kind: output, shape index: {0}]   ;;  %s298_s2 = inlined_call_operand.hbm [shape: f32[1,8], index: 2, kind: output, shape index: {1}]  }
   0x1   :  { %9 = vsyncpa [#allocation6], 0 }
   0x2   :  { %10 = vsyncpa [#allocation9], 0  ;;  %s226_s9 = smov [#allocation4]   ;;  %s154_s13 = scalar_lea.hbm %s296_s0, 128 }
   0x3   :  { %s17_s10 = sshll.u32 %s226_s9, 4  ;;  %p155_p0 = scmp.ne.s32.totalorder %s296_s0, %s154_s13  ;;  %s18_s10 = int_to_ptr.vmem [resolvable:$true] %s17_s10 }
   0x4   :  { %p158_p1 = scmp.lt.u32.totalorder %s154_s13, %s296_s0 }
   0x6   :  { %p160_p2 = pnand %p158_p1, %p155_p0 }
   0x8   :  { %163 = shalt.err (!%p160_p2)
}
   0x9   :  { %s164_s18 = scalar_lea.vmem %s18_s10, 128  ;;  %p169_p4 = scmp.lt.s32.totalorder %s18_s10, %s18_s10 }
   0xa   :  { %p165_p3 = scmp.ne.s32.totalorder %s18_s10, %s164_s18  ;;  %p170_p5 = scmp.lt.s32.totalorder %s164_s18, %s164_s18 }
   0xc   :  { %p171_p6 = por %p170_p5, %p169_p4 }
   0xe   :  { %p172_p7 = pnand %p171_p6, %p165_p3 }
  0x10   :  { %175 = shalt.err (!%p172_p7)
}
  0x11   :  { %20 = dma.hbm_to_vmem [thread:$0]  %s296_s0, 128, %s18_s10, [#allocation5]  }
  0x12   :  { %220 = dma.done.wait [#allocation5], 128  }
  0x13   :  { %221 = vsyncadd [#allocation5], 4294967168  ;;  %vm28_vm0 = vcmask 7168   ;;  %v227_v0 = vmov 0.0   ;;  %vm32_vm1 = vcmask 130048   ;;  %v31_v1 = vld [vmem:[#allocation4] sm:$0xff] }
  0x14   :  { %30 = vst.msk [vmem:[#allocation3] sm:$0xff] %vm28_vm0, %v227_v0  ;;  %v36_v2 = vsel %vm32_vm1, %v31_v1, 0.0  ;;  %v33_v3 = vsel %vm32_vm1, %v31_v1, -inf  ;;  %v228_v4 = vmov -inf   ;;  %s229_s0 = smov [#allocation8]   ;;  %vm82_vm2 = vcmask 57344  }
  0x15   :  { %37 = vadd.xlane.f32.xlu0 %v36_v2  ;;  %29 = vst.msk [vmem:[#allocation2] sm:$0xff] %vm28_vm0, %v228_v4  ;;  %s136_s21 = sshll.u32 %s229_s0, 4  ;;  %s230_s22 = smov [#allocation7]   ;;  %s137_s21 = int_to_ptr.vmem [resolvable:$true] %s136_s21 }
  0x16   :  { %s126_s23 = sshll.u32 %s230_s22, 4  ;;  %s176_s24 = scalar_lea.vmem %s137_s21, 16  ;;  %s262_s23 = int_to_ptr.vmem [resolvable:$true] %s126_s23 }
  0x17   :  { %p177_p8 = scmp.ne.s32.totalorder %s137_s21, %s176_s24  ;;  %s180_s25 = scalar_lea.vmem %s137_s21, 32 }
  0x18   :  { %p181_p9 = scmp.lt.s32.totalorder %s137_s21, %s137_s21  ;;  %p182_p10 = scmp.lt.s32.totalorder %s180_s25, %s176_s24 }
  0x19   :  { %34 = vmax.xlane.f32.xlu0 %v33_v3 }
  0x1a   :  { %p183_p11 = por %p182_p10, %p181_p9 }
  0x1b   :  { %v43_v5 = vld [vmem:[#allocation3] sm:$0xff] }
  0x1c   :  { %v39_v8 = vld [vmem:[#allocation2] sm:$0xff]  ;;  %p184_p12 = pnand %p183_p11, %p177_p8 }
  0xa2   :  { %v38_v6 = vpop.xlane.xlu0 %37 }
  0xa3   :  { %v44_v7 = vadd.f32 %v43_v5, %v38_v6 }
  0xa5   :  { %45 = vst.msk [vmem:[#allocation3] sm:$0xff] %vm28_vm0, %v44_v7 }
  0xa6   :  { %v35_v9 = vpop.xlane.xlu0 %34 }
  0xa7   :  { %v40_v10 = vmax.f32 %v39_v8, %v35_v9 }
  0xa9   :  { %42 = vst.msk [vmem:[#allocation2] sm:$0xff] %vm28_vm0, %v40_v10 }
  0xac   :  { %v84_v11 = vld [vmem:[#allocation3] sm:$0xff] }
  0xad   :  { %85 = vxpose.xlu1.b32.start.end [1/1] (short) (narrow) %v84_v11, 8 }
  0xb0   :  { %v49_v12 = vld [vmem:[#allocation2] sm:$0xff] }
  0xb1   :  { %50 = vxpose.xlu1.b32.start.end [1/1] (short) (narrow) %v49_v12, 8 }
 0x12d   :  { %v101_v13 = vpop.trf.xlu1 }
 0x12e   :  { %v118_v14 = vmul.f32 0.0625, %v101_v13 }
 0x130   :  { %119 = vst.msk [vmem:[#allocation8] sm:$0x1] %vm82_vm2, %v118_v14 }
 0x131   :  { %v66_v15 = vpop.trf.xlu1 }
 0x132   :  { %187 = shalt.err (!%p184_p12)
}
 0x133   :  { %s188_s28 = scalar_lea.hbm %s298_s2, 16 }
 0x134   :  { %p189_p13 = scmp.ne.s32.totalorder %s298_s2, %s188_s28  ;;  %p192_p0 = scmp.lt.u32.totalorder %s188_s28, %s298_s2 }
 0x136   :  { %p194_p1 = pnand %p192_p0, %p189_p13 }
 0x138   :  { %197 = shalt.err (!%p194_p1)
}
 0x139   :  { %139 = dma.vmem_to_hbm [thread:$0]  %s137_s21, 16, %s298_s2, [#allocation9]   ;;  %83 = vst.msk [vmem:[#allocation7] sm:$0x1] %vm82_vm2, %v66_v15 }
 0x13a   :  { %s198_s7 = scalar_lea.vmem %s262_s23, 16  ;;  %s202_s8 = scalar_lea.vmem %s262_s23, 32 }
 0x13b   :  { %p199_p2 = scmp.ne.s32.totalorder %s262_s23, %s198_s7  ;;  %p203_p3 = scmp.lt.s32.totalorder %s262_s23, %s262_s23 }
 0x13c   :  { %p204_p4 = scmp.lt.s32.totalorder %s202_s8, %s198_s7 }
 0x13e   :  { %p205_p5 = por %p204_p4, %p203_p3 }
 0x140   :  { %p206_p6 = pnand %p205_p5, %p199_p2 }
 0x142   :  { %209 = shalt.err (!%p206_p6)
}
 0x143   :  { %s210_s11 = scalar_lea.hbm %s297_s1, 16 }
 0x144   :  { %p211_p7 = scmp.ne.s32.totalorder %s297_s1, %s210_s11  ;;  %p214_p8 = scmp.lt.u32.totalorder %s210_s11, %s297_s1 }
 0x146   :  { %p216_p9 = pnand %p214_p8, %p211_p7 }
 0x148   :  { %219 = shalt.err (!%p216_p9)
}
 0x149   :  { %129 = dma.vmem_to_hbm [thread:$0]  %s262_s23, 16, %s297_s1, [#allocation6]  }
 0x14a   :  { %222 = dma.done.wait [#allocation6], 16  }
 0x14b   :  { %223 = vsyncadd [#allocation6], 4294967280 }
 0x14c   :  { %224 = dma.done.wait [#allocation9], 16  }
 0x14d   :  { %225 = vsyncadd [#allocation9], 4294967280 }
 0x14e   :  { %146 = vsyncpa [#allocation5], 1 }
 0x14f   :  { %147 = vsyncpa [#allocation6], 1 }
 0x150   :  { %148 = vsyncpa [#allocation9], 1 }

</bundles_post_ra>
